<compile_context>
chip_gen: v6e
topology: v6e:2x2x1
jax: 0.10.0
libtpu: 0.0.40
codegen_flags: <defaults>
</compile_context>

<pallas_src>
import functools

import jax
import jax.numpy as jnp
from jax.experimental import pallas as pl
from jax.experimental.pallas import tpu as pltpu


def _round_up(x: int, m: int) -> int:
    return ((x + m - 1) // m) * m


def _sublane_multiple(dtype) -> int:
    """Sublane packing factor: 8 for 4-byte, 16 for 2-byte, 32 for 1-byte."""
    return {4: 8, 2: 16, 1: 32}.get(jnp.dtype(dtype).itemsize, 8)


def _vmem_capacity_bytes() -> int:
    """Generation-aware VMEM capacity; conservative (v7x-sized) fallback."""
    try:
        return int(pltpu.get_tpu_info().vmem_capacity_bytes)
    except Exception:
        return 64 << 20


def _act_is_transcendental(act_func) -> bool:
    if act_func is None:
        return False
    cands = []
    for mod, names in (
        (jax.nn, ("gelu", "sigmoid", "silu", "swish", "softplus", "tanh",
                  "elu", "celu", "selu", "log_sigmoid", "log_softmax", "softmax")),
        (jnp, ("tanh", "exp", "log", "expm1", "log1p")),
    ):
        for n in names:
            f = getattr(mod, n, None)
            if f is not None:
                cands.append(f)
    return any(act_func is f for f in cands)


def _bias_comp_kernel(x_ref, b_ref, o_ref, *, act_func):
    # x_ref: (TR, TL) activation tile; b_ref: (TR, 1) per-row bias tile.
    out = x_ref[...] + b_ref[...]          # row-broadcast add on the VPU
    if act_func is not None:
        out = act_func(out)
    o_ref[...] = out.astype(o_ref.dtype)


def bias_compensation_forward(x_nchw, bias, act_func=None, *,
                              max_block_bytes=None):
    """Pallas implementation of BiasCompensation.forward for NCHW inputs.

    Args:
      x_nchw: (N, C, H, W) activation.
      bias:   (C,) learned bias (channel_axis=(1,)).
      act_func: optional elementwise activation applied after the bias add.
      max_block_bytes: optional override of the per-block VMEM byte budget
        (mainly for testing the tiled/ragged code paths at small shapes).
    Returns:
      (N, C, H, W) array, same dtype as x_nchw (matches torch's in-place
      `output += bias`, which casts the bias to output's dtype).
    """
    N, C, H, W = x_nchw.shape
    assert bias.shape == (C,)
    dtype = x_nchw.dtype
    itemsize = jnp.dtype(dtype).itemsize
    sub_mult = _sublane_multiple(dtype)

    R = N * C
    L = H * W

    # --- XLA glue: flatten NCHW -> (R, L), expand bias to per-row column ----
    x2d = x_nchw.reshape(R, L)
    b2d = jnp.tile(bias.astype(dtype), (N,)).reshape(R, 1)

    # ---- generation-aware per-block budget (double-buffered in + out + bias)
    vmem_cap = _vmem_capacity_bytes()                 # 64 MiB v7x, 128 MiB v5e/v6e
    usable = max(vmem_cap - (8 << 20), 24 << 20)      # leave headroom
    block_budget = max(usable // 8, 128 * 128 * itemsize)
    if max_block_bytes is not None:
        block_budget = max(int(max_block_bytes), sub_mult * 128 * itemsize)

    # ---- lane tile: prefer full-width contiguous slabs ----------------------
    if L <= 128 or sub_mult * _round_up(L, 128) * itemsize <= block_budget:
        TL = L                                        # full dim (always legal)
    else:
        lanes_budget = max(128, (block_budget // (sub_mult * itemsize)) // 128 * 128)
        TL = min(lanes_budget, max(128, (L // 128) * 128))   # 128-multiple; cdiv tail

    # ---- row tile: fill the remaining budget, keep sublane alignment --------
    TL_pad = _round_up(TL, 128)
    rows_budget = max(1, block_budget // (TL_pad * itemsize))
    if R <= sub_mult:
        TR = R                                        # full dim (always legal)
    else:
        TR = min(rows_budget, R)
        TR = max(sub_mult, (TR // sub_mult) * sub_mult)
        # Ensure >= 2 row blocks so both v7x TensorCores get work (one extra
        # ~0.35 us grid step elsewhere is noise).
        if pl.cdiv(R, TR) < 2:
            TR = max(sub_mult, _round_up(pl.cdiv(R, 2), sub_mult))

    grid = (pl.cdiv(R, TR), pl.cdiv(L, TL))

    # ---- VMEM limit: actual double-buffered footprint + slack, floor 32 MiB
    # (v5e's default scoped limit is only 16 MiB), capped below capacity.
    TR_pad = _round_up(TR, sub_mult)
    block_bytes = TR_pad * TL_pad * itemsize
    bias_bytes = TR_pad * 128 * itemsize              # bias column lane-pads to 128
    needed = 2 * (2 * block_bytes + bias_bytes)
    vmem_limit = int(min(max(needed * 5 // 4 + (2 << 20), 32 << 20),
                         max(vmem_cap - (8 << 20), 32 << 20)))

    # ---- cost estimate: streaming add (+ activation); transcendentals only
    # when the activation really uses the EUP.
    elems = R * L
    flops = elems * (2 if act_func is not None else 1)
    cost = pl.CostEstimate(
        flops=flops,
        transcendentals=elems if _act_is_transcendental(act_func) else 0,
        bytes_accessed=2 * elems * itemsize + R * itemsize)

    kernel = functools.partial(_bias_comp_kernel, act_func=act_func)

    out2d = pl.pallas_call(
        kernel,
        out_shape=jax.ShapeDtypeStruct((R, L), dtype),
        grid=grid,
        in_specs=[
            pl.BlockSpec((TR, TL), lambda i, j: (i, j)),   # activation tile
            pl.BlockSpec((TR, 1), lambda i, j: (i, 0)),    # per-row-tile bias
        ],
        out_specs=pl.BlockSpec((TR, TL), lambda i, j: (i, j)),
        compiler_params=pltpu.CompilerParams(
            dimension_semantics=("parallel", "parallel"),
            vmem_limit_bytes=vmem_limit),
        cost_estimate=cost,
    )(x2d, b2d)

    return out2d.reshape(N, C, H, W)


if __name__ == "__main__":
    key = jax.random.PRNGKey(0)
    kx1, kb1, kx2, kb2, kx3, kb3 = jax.random.split(key, 6)

    # ---- test 1: module-default forward (act_func=None), small NCHW shape ---
    N, C, H, W = 2, 4, 16, 16
    x = jax.random.normal(kx1, (N, C, H, W), dtype=jnp.float32)
    # Module initializes bias to zeros; use a non-zero bias (as if calibrated
    # via update()) so the kernel path is actually exercised.
    bias = jax.random.normal(kb1, (C,), dtype=jnp.float32) * 0.1

    fwd = jax.jit(functools.partial(bias_compensation_forward, act_func=None))
    out = jax.block_until_ready(fwd(x, bias))
    ref = x + bias.reshape(1, C, 1, 1)
    assert out.shape == x.shape and out.dtype == x.dtype
    assert jnp.allclose(out, ref, atol=1e-6, rtol=1e-6)

    # ---- test 2: 7x7 map (non-128-multiple lanes), relu, multi-row-block ----
    N2, C2, H2, W2 = 2, 32, 7, 7
    x2 = jax.random.normal(kx2, (N2, C2, H2, W2), dtype=jnp.float32)
    bias2 = jax.random.normal(kb2, (C2,), dtype=jnp.float32) * 0.1

    fwd2 = jax.jit(functools.partial(bias_compensation_forward,
                                     act_func=jax.nn.relu))
    out2 = jax.block_until_ready(fwd2(x2, bias2))
    ref2 = jax.nn.relu(x2 + bias2.reshape(1, C2, 1, 1))
    assert out2.shape == x2.shape and out2.dtype == x2.dtype
    assert jnp.allclose(out2, ref2, atol=1e-6, rtol=1e-6)

    # ---- test 3: forced small block budget -> cdiv row & lane tails ---------
    N3, C3, H3, W3 = 2, 17, 18, 20          # R=34 (ragged rows), L=360 (ragged lanes)
    x3 = jax.random.normal(kx3, (N3, C3, H3, W3), dtype=jnp.float32)
    bias3 = jax.random.normal(kb3, (C3,), dtype=jnp.float32) * 0.1

    fwd3 = jax.jit(functools.partial(bias_compensation_forward,
                                     act_func=jax.nn.relu,
                                     max_block_bytes=8 * 128 * 4))
    out3 = jax.block_until_ready(fwd3(x3, bias3))
    ref3 = jax.nn.relu(x3 + bias3.reshape(1, C3, 1, 1))
    assert out3.shape == x3.shape and out3.dtype == x3.dtype
    assert jnp.allclose(out3, ref3, atol=1e-6, rtol=1e-6)

    print("KERNEL_OK")
</pallas_src>

<mosaic_0001>
module attributes {stable_mosaic.version = 11 : i64} {
  func.func @_bias_comp_kernel(%arg0: i32, %arg1: i32, %arg2: memref<8x256xf32, #tpu.memory_space<vmem>>, %arg3: memref<8x1xf32, #tpu.memory_space<vmem>>, %arg4: memref<8x256xf32, #tpu.memory_space<vmem>>) attributes {dimension_semantics = [#tpu.dimension_semantics<parallel>, #tpu.dimension_semantics<parallel>], iteration_bounds = array<i64: 1, 1>, scalar_prefetch = 0 : i64, scratch_operands = 0 : i64, tpu.core_type = #tpu.core_type<tc>, window_params = [{transform_indices = @transform_0, window_bounds = array<i64: 8, 256>}, {transform_indices = @transform_1, window_bounds = array<i64: 8, 1>}, {transform_indices = @transform_2, window_bounds = array<i64: 8, 256>}]} {
    %c0 = arith.constant 0 : index
    %c0_0 = arith.constant 0 : index
    %0 = vector.load %arg2[%c0, %c0_0] : memref<8x256xf32, #tpu.memory_space<vmem>>, vector<8x256xf32>
    %c0_1 = arith.constant 0 : index
    %c0_2 = arith.constant 0 : index
    %1 = vector.load %arg3[%c0_1, %c0_2] : memref<8x1xf32, #tpu.memory_space<vmem>>, vector<8x1xf32>
    %2 = vector.broadcast %1 : vector<8x1xf32> to vector<8x256xf32>
    %3 = arith.addf %0, %2 : vector<8x256xf32>
    %c0_3 = arith.constant 0 : index
    %c0_4 = arith.constant 0 : index
    %4 = vector.load %arg4[%c0_3, %c0_4] : memref<8x256xf32, #tpu.memory_space<vmem>>, vector<8x256xf32>
    tpu.vector_store %arg4[%c0_3, %c0_4], %3 {strides = array<i32>} : memref<8x256xf32, #tpu.memory_space<vmem>>, vector<8x256xf32>,
    return
  }
  func.func @transform_0(%arg0: i32, %arg1: i32) -> (i32, i32) {
    %c0_i32 = arith.constant 0 : i32
    return %arg0, %arg1 : i32, i32
  }
  func.func @transform_1(%arg0: i32, %arg1: i32) -> (i32, i32) {
    %c0_i32 = arith.constant 0 : i32
    %c0_i32_0 = arith.constant 0 : i32
    return %arg0, %c0_i32 : i32, i32
  }
  func.func @transform_2(%arg0: i32, %arg1: i32) -> (i32, i32) {
    %c0_i32 = arith.constant 0 : i32
    return %arg0, %arg1 : i32, i32
  }
}

</mosaic_0001>

<bundles_post_ra>
// kernel: tile.0
= control target key start
LH: loop header
LB: loop body
LE: loop exit
PB: predicated region body
PF: predicated region fallthrough
CT: control target
= control target key end

     0   :  { %s35_s8 = smov 125   ;;  %vm8_vm0 = vcmask 7168   ;;  %s36_s11 = smov 126   ;;  %s62_s0 = inlined_call_operand.vmem [shape: f32[2,4], index: 0, kind: input, shape index: {}]   ;;  %s63_s1 = inlined_call_operand.vmem [shape: f32[8,1], index: 1, kind: output, shape index: {}]  }
   0x1   :  { %v5_v0 = vld [vmem:[%s62_s0] sm:$0x3]  ;;  %s34_s0 = smov 127  }
   0x2   :  { %6 = vst [vmem:[#allocation0] sm:$0x3] %v5_v0 }
   0x9   :  { %v10_v1 = vld [vmem:[#allocation0] sm:$0x3]  }
   0xa   :  { %v22_v2 = vld [vmem:[#allocation0] sm:$0x3]   ;;  %11 = vrot.lane.b32.xlu0 %v10_v1, %s34_s0 }
   0xb   :  { %23 = vrot.lane.b32.xlu1 %v22_v2, %s35_s8  ;;  %v7_v3 = vld [vmem:[#allocation0] sm:$0x3]  }
   0xc   :  { %v16_v4 = vld [vmem:[#allocation0] sm:$0x3]   ;;  %9 = vst.msk [vmem:[%s63_s1] ss:$4 sm:$0x3] %vm8_vm0, %v7_v3  }
   0xe   :  { %17 = vrot.lane.b32.xlu0 %v16_v4, %s36_s11 }
  0x7c   :  { %v12_v5 = vpop.permute.xlu0 %11  }
  0x7d   :  { %v24_v6 = vpop.permute.xlu1 %23   ;;  %28 = vst.msk [vmem:[%s63_s1 + $0x1] ss:$4 sm:$0x3] %vm8_vm0, %v12_v5  }
  0x7e   :  { %30 = vst.msk [vmem:[%s63_s1 + $0x3] ss:$4 sm:$0x3] %vm8_vm0, %v24_v6  }
  0x80   :  { %v18_v7 = vpop.permute.xlu0 %17  }
  0x81   :  { %29 = vst.msk [vmem:[%s63_s1 + $0x2] ss:$4 sm:$0x3] %vm8_vm0, %v18_v7  }

// kernel: tile.8
= control target key start
LH: loop header
LB: loop body
LE: loop exit
PB: predicated region body
PF: predicated region fallthrough
CT: control target
= control target key end

     0   :  { %s22_s0 = inlined_call_operand.vmem [shape: f32[4], index: 0, kind: input, shape index: {}]   ;;  %s23_s1 = inlined_call_operand.vmem [shape: f32[2,4], index: 1, kind: output, shape index: {}]  }
   0x1   :  { %v4_v0 = vld [vmem:[%s22_s0] ss:$0 sm:$0xff] }
   0x2   :  { %5 = vst [vmem:[%s23_s1] sm:$0x3] %v4_v0 }

// kernel: bias_compensation_forward.1
= control target key start
LH: loop header
LB: loop body
LE: loop exit
PB: predicated region body
PF: predicated region fallthrough
CT: control target
= control target key end

     0   :  { %v29_v0 = vmov 0   ;;  %s60_s1 = inlined_call_operand.vmem [shape: f32[8,1], index: 1, kind: input, shape index: {}]   ;;  %s61_s0 = inlined_call_operand.vmem [shape: f32[8,256], index: 0, kind: input, shape index: {}]   ;;  %s62_s2 = inlined_call_operand.vmem [shape: f32[8,256], index: 2, kind: output, shape index: {}]  }
   0x1   :  { %28 = vset.pattern.permute.xlu0 %v29_v0  ;;  %v13_v1 = vld [vmem:[%s60_s1] sm:$0xff]  ;;  %v12_v3 = vld [vmem:[%s61_s0 + $0x8] sm:$0xff] }
   0x2   :  { %16 = vperm.xlu0 %28, %v13_v1   ;;  %v11_v2 = vld [vmem:[%s61_s0] sm:$0xff] }
  0x7d   :  { %v17_v4 = vpop.permute.xlu0 %16 }
  0x7e   :  { %v19_v5 = vadd.f32 %v17_v4, %v11_v2  ;;  %v20_v6 = vadd.f32 %v17_v4, %v12_v3 }
  0x80   :  { %21 = vst [vmem:[%s62_s2] sm:$0xff] %v19_v5  ;;  %22 = vst [vmem:[%s62_s2 + $0x8] sm:$0xff] %v20_v6 }

</bundles_post_ra>
